<compile_context>
chip_gen: v6e
topology: v6e:2x2x1
jax: 0.10.0
libtpu: 0.0.40
codegen_flags: <defaults>
</compile_context>

<pallas_src>
import functools

import jax
import jax.numpy as jnp
from jax.experimental import pallas as pl
from jax.experimental.pallas import tpu as pltpu

_PD_EPS = 1e-6   # nn.PairwiseDistance default eps (added element-wise to the diff)
_EPS = 1e-15     # module's self.eps
_TB_CAP = 4096   # sanity cap on the batch tile (review: allow 2048-4096)


def _round_up(x, m):
    return ((x + m - 1) // m) * m


def _vmem_budgets():
    """Generation-aware (input_tile_budget_bytes, vmem_limit_ceiling_bytes)."""
    cap = 64 << 20  # conservative fallback: v7x-class 64 MiB per TensorCore
    try:
        info = pltpu.get_tpu_info()
        queried = getattr(info, "vmem_capacity_bytes", None)
        if queried:
            cap = int(queried)
    except Exception:
        pass
    if cap >= (96 << 20):
        # v5e / v6e: 128 MiB VMEM -> bigger double-buffered input tiles.
        return 40 << 20, 56 << 20
    # v7x-class: 64 MiB VMEM per TC -> keep scoped request <= 32 MiB.
    return 20 << 20, 32 << 20


def _pick_tiles(B, D, itemsize, input_budget):
    """Choose (tb, td) so 2 inputs x 2 pipeline buffers x tb x td fits the budget."""
    sub = max(8, 32 // itemsize)                # native sublane tile: 8 f32, 16 bf16
    per_row_full_d = 4 * D * itemsize           # one row, both inputs, double-buffered
    tb_max = input_budget // per_row_full_d
    if tb_max >= sub:
        # Full feature dim fits: tile the batch only (budget-driven, no 1024 cap).
        tb = min(_round_up(B, sub), (tb_max // sub) * sub, _TB_CAP)
        tb = max(tb, sub)
        # Megacore (v7x): make sure the "parallel" batch axis has >= 2 tiles
        # whenever B is large enough to split, so both TensorCores get work.
        if B >= 2 * sub and tb >= B:
            tb = max(sub, _round_up((B + 1) // 2, sub))
        return tb, D
    # Huge flattened D: also chunk the feature dim (multiple of 128 lanes).
    tb = sub
    td_max = input_budget // (4 * tb * itemsize)
    td = max(128, (td_max // 128) * 128)
    td = min(td, _round_up(D, 128))
    return tb, td


def _euclidean_loss_kernel_single(x_ref, y_ref, o_ref):
    """nk == 1 fast path: no scratch, no init/finalize predicates."""
    x = x_ref[...].astype(jnp.float32)
    y = y_ref[...].astype(jnp.float32)
    diff = x - y + _PD_EPS
    dist = jnp.sqrt(jnp.sum(diff * diff, axis=1, keepdims=True))
    denom = (jnp.sqrt(jnp.sum(x * x, axis=1, keepdims=True)) +
             jnp.sqrt(jnp.sum(y * y, axis=1, keepdims=True)) + _EPS)
    o_ref[...] = dist * pl.reciprocal(denom, approx=False)


def _euclidean_loss_kernel_multi(x_ref, y_ref, o_ref, acc_ref, *,
                                 d_total, td, mask_cols):
    """Grid = (batch tiles i, feature chunks k). Fused (tb, 3) accumulator:
       lane 0 = sum diff^2, lane 1 = sum x^2, lane 2 = sum y^2."""
    k = pl.program_id(1)
    k_last = pl.num_programs(1) - 1

    @pl.when(k == 0)
    def _init():
        acc_ref[...] = jnp.zeros_like(acc_ref)

    # Widen in-vreg (no-op for f32; keeps all math in f32 — required on v5e).
    x = x_ref[...].astype(jnp.float32)
    y = y_ref[...].astype(jnp.float32)

    lane3 = jax.lax.broadcasted_iota(jnp.int32, acc_ref.shape, 1)   # (tb, 3)

    def _accumulate(xv, yv, dv):
        sdd = jnp.sum(dv * dv, axis=1, keepdims=True)    # (tb, 1)
        sxx = jnp.sum(xv * xv, axis=1, keepdims=True)
        syy = jnp.sum(yv * yv, axis=1, keepdims=True)
        # Pack the three partial sums into lanes 0/1/2 -> single RMW per step.
        acc_ref[...] += jnp.where(lane3 == 0, sdd,
                                  jnp.where(lane3 == 1, sxx, syy))

    if mask_cols:
        # Only the last feature chunk overruns D -> mask there only; all other
        # chunks take the cheap unmasked path (saves ~2.5 VPU ops/element).
        @pl.when(k < k_last)
        def _full():
            _accumulate(x, y, x - y + _PD_EPS)

        @pl.when(k == k_last)
        def _tail():
            col = jax.lax.broadcasted_iota(jnp.int32, x.shape, 1) + k * td
            valid = col < d_total
            xm = jnp.where(valid, x, 0.0)
            ym = jnp.where(valid, y, 0.0)
            dm = jnp.where(valid, x - y + _PD_EPS, 0.0)
            _accumulate(xm, ym, dm)
    else:
        _accumulate(x, y, x - y + _PD_EPS)

    @pl.when(k == k_last)
    def _finalize():
        r = jnp.sqrt(acc_ref[...])                       # (tb, 3) = [dist, ||x||, ||y||]
        is_dist = lane3 == 0
        dist = jnp.sum(jnp.where(is_dist, r, 0.0), axis=1, keepdims=True)
        denom = jnp.sum(jnp.where(is_dist, 0.0, r), axis=1, keepdims=True) + _EPS
        # Exact reciprocal (approx=True would exceed the 1e-5 tolerance).
        o_ref[...] = dist * pl.reciprocal(denom, approx=False)


def euclidean_loss(inp, target, *, tb=None, td=None):
    """Pallas implementation of EuclideanLoss.forward(inp, target)."""
    if inp.ndim > 2:
        # Matches the PyTorch module: flattens dims 1 and 2 (assumes 3-D input;
        # like the reference, ndim > 3 is not supported).
        b = inp.shape[0]
        inp = inp.reshape(b, inp.shape[1] * inp.shape[2])
        target = target.reshape(b, target.shape[1] * target.shape[2])

    B, D = inp.shape
    itemsize = jnp.dtype(inp.dtype).itemsize

    input_budget, vmem_ceiling = _vmem_budgets()
    auto_tb, auto_td = _pick_tiles(B, D, itemsize, input_budget)
    tb = auto_tb if tb is None else tb
    td = auto_td if td is None else td

    nb = pl.cdiv(B, tb)
    nk = pl.cdiv(D, td)
    if nk == 1:
        td = D                                   # single chunk always spans full D

    # Scoped-VMEM request: double-buffered inputs + tiny output/accumulator,
    # plus headroom for Mosaic internal scratch; clamped per generation.
    vmem_need = 4 * tb * td * itemsize + 2 * tb * 4 + 3 * tb * 4
    vmem_limit = int(min(max(vmem_need + (8 << 20), 8 << 20), vmem_ceiling))

    cost = pl.CostEstimate(
        flops=7 * B * D,
        transcendentals=4 * B,
        bytes_accessed=2 * B * D * itemsize + 4 * B,
    )

    if nk == 1:
        ratios = pl.pallas_call(
            _euclidean_loss_kernel_single,
            out_shape=jax.ShapeDtypeStruct((B, 1), jnp.float32),
            grid_spec=pltpu.PrefetchScalarGridSpec(
                num_scalar_prefetch=0,
                grid=(nb,),
                in_specs=[
                    pl.BlockSpec((tb, td), lambda i: (i, 0)),
                    pl.BlockSpec((tb, td), lambda i: (i, 0)),
                ],
                out_specs=pl.BlockSpec((tb, 1), lambda i: (i, 0)),
            ),
            compiler_params=pltpu.CompilerParams(
                dimension_semantics=("parallel",),
                vmem_limit_bytes=vmem_limit,
            ),
            cost_estimate=cost,
        )(inp, target)
    else:
        mask_cols = (D % td) != 0
        kernel = functools.partial(
            _euclidean_loss_kernel_multi, d_total=D, td=td, mask_cols=mask_cols)
        ratios = pl.pallas_call(
            kernel,
            out_shape=jax.ShapeDtypeStruct((B, 1), jnp.float32),
            grid_spec=pltpu.PrefetchScalarGridSpec(
                num_scalar_prefetch=0,
                grid=(nb, nk),                   # reduction axis (k) last
                in_specs=[
                    pl.BlockSpec((tb, td), lambda i, k: (i, k)),
                    pl.BlockSpec((tb, td), lambda i, k: (i, k)),
                ],
                out_specs=pl.BlockSpec((tb, 1), lambda i, k: (i, 0)),
                scratch_shapes=[pltpu.VMEM((tb, 3), jnp.float32)],
            ),
            compiler_params=pltpu.CompilerParams(
                dimension_semantics=("parallel", "arbitrary"),
                vmem_limit_bytes=vmem_limit,
            ),
            cost_estimate=cost,
        )(inp, target)

    # Tiny final reduction (B values) in the wrapper; divide by the true B.
    return jnp.sum(ratios) / B


def _reference(inp, target):
    # Pure-JAX reference for correctness checking.
    if inp.ndim > 2:
        b = inp.shape[0]
        inp = inp.reshape(b, inp.shape[1] * inp.shape[2])
        target = target.reshape(b, target.shape[1] * target.shape[2])
    dist = jnp.linalg.norm(inp - target + _PD_EPS, axis=1)
    denom = jnp.linalg.norm(inp, axis=1) + jnp.linalg.norm(target, axis=1) + _EPS
    return jnp.sum(dist / denom) / inp.shape[0]


if __name__ == "__main__":
    key = jax.random.PRNGKey(0)
    k1, k2, k3, k4, k5, k6 = jax.random.split(key, 6)

    # Case 1: 3-D batch (B=2, 8, 32) -> flattened (2, 256); auto tiles, nk == 1 path.
    a = jax.random.normal(k1, (2, 8, 32), dtype=jnp.float32)
    b = jax.random.normal(k2, (2, 8, 32), dtype=jnp.float32)
    out1 = euclidean_loss(a, b)
    jax.block_until_ready(out1)
    ref1 = _reference(a, b)
    assert jnp.allclose(out1, ref1, rtol=1e-5, atol=1e-6), (out1, ref1)

    # Case 2: forced multi-chunk grid — partial last batch tile (B=20, tb=8) and
    # lane-masked last feature chunk (D=200, td=128 -> nk=2).
    c = jax.random.normal(k3, (20, 200), dtype=jnp.float32)
    d = jax.random.normal(k4, (20, 200), dtype=jnp.float32)
    out2 = euclidean_loss(c, d, tb=8, td=128)
    jax.block_until_ready(out2)
    ref2 = _reference(c, d)
    assert jnp.allclose(out2, ref2, rtol=1e-5, atol=1e-6), (out2, ref2)

    # Case 3: bf16 inputs stream at native width (no wrapper up-cast); math in f32.
    a16 = a.astype(jnp.bfloat16)
    b16 = b.astype(jnp.bfloat16)
    out3 = euclidean_loss(a16, b16)
    jax.block_until_ready(out3)
    ref3 = _reference(a16.astype(jnp.float32), b16.astype(jnp.float32))
    assert jnp.allclose(out3, ref3, rtol=1e-4, atol=1e-5), (out3, ref3)

    # Case 4: B=32 -> auto batch-tile split (nb >= 2, megacore-parallel path).
    e = jax.random.normal(k5, (32, 8, 32), dtype=jnp.float32)
    f = jax.random.normal(k6, (32, 8, 32), dtype=jnp.float32)
    out4 = euclidean_loss(e, f)
    jax.block_until_ready(out4)
    ref4 = _reference(e, f)
    assert jnp.allclose(out4, ref4, rtol=1e-5, atol=1e-6), (out4, ref4)

    # Case 5: forced multi-chunk grid with D % td == 0 (unmasked accumulate branch).
    out5 = euclidean_loss(e.reshape(32, 256), f.reshape(32, 256), tb=8, td=128)
    jax.block_until_ready(out5)
    assert jnp.allclose(out5, ref4, rtol=1e-5, atol=1e-6), (out5, ref4)

    print("KERNEL_OK")
</pallas_src>

<mosaic_0001>
module attributes {stable_mosaic.version = 11 : i64} {
  func.func @_euclidean_loss_kernel_single(%arg0: i32, %arg1: memref<8x256xf32, #tpu.memory_space<vmem>>, %arg2: memref<8x256xf32, #tpu.memory_space<vmem>>, %arg3: memref<8x1xf32, #tpu.memory_space<vmem>>) attributes {dimension_semantics = [#tpu.dimension_semantics<parallel>], iteration_bounds = array<i64: 1>, scalar_prefetch = 0 : i64, scratch_operands = 0 : i64, tpu.core_type = #tpu.core_type<tc>, window_params = [{transform_indices = @transform_0, window_bounds = array<i64: 8, 256>}, {transform_indices = @transform_1, window_bounds = array<i64: 8, 256>}, {transform_indices = @transform_2, window_bounds = array<i64: 8, 1>}]} {
    %c0 = arith.constant 0 : index
    %c0_0 = arith.constant 0 : index
    %0 = vector.load %arg1[%c0, %c0_0] : memref<8x256xf32, #tpu.memory_space<vmem>>, vector<8x256xf32>
    %c0_1 = arith.constant 0 : index
    %c0_2 = arith.constant 0 : index
    %1 = vector.load %arg2[%c0_1, %c0_2] : memref<8x256xf32, #tpu.memory_space<vmem>>, vector<8x256xf32>
    %2 = arith.subf %0, %1 : vector<8x256xf32>
    %cst = arith.constant 9.99999997E-7 : f32
    %3 = vector.broadcast %cst : f32 to vector<8x256xf32>
    %4 = arith.addf %2, %3 : vector<8x256xf32>
    %5 = arith.mulf %4, %4 : vector<8x256xf32>
    %cst_3 = arith.constant dense<0.000000e+00> : vector<8xf32>
    %6 = vector.multi_reduction <add>, %5, %cst_3 [1] : vector<8x256xf32> to vector<8xf32>
    %7 = vector.shape_cast %6 : vector<8xf32> to vector<8x1xf32>
    %8 = math.sqrt %7 : vector<8x1xf32>
    %9 = arith.mulf %0, %0 : vector<8x256xf32>
    %cst_4 = arith.constant dense<0.000000e+00> : vector<8xf32>
    %10 = vector.multi_reduction <add>, %9, %cst_4 [1] : vector<8x256xf32> to vector<8xf32>
    %11 = vector.shape_cast %10 : vector<8xf32> to vector<8x1xf32>
    %12 = math.sqrt %11 : vector<8x1xf32>
    %13 = arith.mulf %1, %1 : vector<8x256xf32>
    %cst_5 = arith.constant dense<0.000000e+00> : vector<8xf32>
    %14 = vector.multi_reduction <add>, %13, %cst_5 [1] : vector<8x256xf32> to vector<8xf32>
    %15 = vector.shape_cast %14 : vector<8xf32> to vector<8x1xf32>
    %16 = math.sqrt %15 : vector<8x1xf32>
    %17 = arith.addf %12, %16 : vector<8x1xf32>
    %cst_6 = arith.constant 1.000000e-15 : f32
    %18 = vector.broadcast %cst_6 : f32 to vector<8x1xf32>
    %19 = arith.addf %17, %18 : vector<8x1xf32>
    %20 = tpu.reciprocal %19 : vector<8x1xf32> -> vector<8x1xf32>
    %21 = arith.mulf %8, %20 : vector<8x1xf32>
    %c0_7 = arith.constant 0 : index
    %c0_8 = arith.constant 0 : index
    %22 = vector.load %arg3[%c0_7, %c0_8] : memref<8x1xf32, #tpu.memory_space<vmem>>, vector<8x1xf32>
    tpu.vector_store %arg3[%c0_7, %c0_8], %21 {strides = array<i32>} : memref<8x1xf32, #tpu.memory_space<vmem>>, vector<8x1xf32>,
    return
  }
  func.func @transform_0(%arg0: i32) -> (i32, i32) {
    %c0_i32 = arith.constant 0 : i32
    %c0_i32_0 = arith.constant 0 : i32
    return %arg0, %c0_i32 : i32, i32
  }
  func.func @transform_1(%arg0: i32) -> (i32, i32) {
    %c0_i32 = arith.constant 0 : i32
    %c0_i32_0 = arith.constant 0 : i32
    return %arg0, %c0_i32 : i32, i32
  }
  func.func @transform_2(%arg0: i32) -> (i32, i32) {
    %c0_i32 = arith.constant 0 : i32
    %c0_i32_0 = arith.constant 0 : i32
    return %arg0, %c0_i32 : i32, i32
  }
}

</mosaic_0001>

<bundles_post_ra>
// kernel: tpu_custom_call.1
= control target key start
LH: loop header
LB: loop body
LE: loop exit
PB: predicated region body
PF: predicated region fallthrough
CT: control target
= control target key end

     0   :  { %7 = vsyncpa [#allocation3], 0  ;;  %s304_s0 = inlined_call_operand.hbm [shape: f32[2,256], index: 0, kind: input, shape index: {}]   ;;  %s305_s1 = inlined_call_operand.hbm [shape: f32[2,256], index: 1, kind: input, shape index: {}]   ;;  %s306_s2 = inlined_call_operand.vmem [shape: f32[2,1], index: 2, kind: output, shape index: {}]  }
   0x1   :  { %8 = vsyncpa [#allocation5], 0 }
   0x2   :  { %13 = vsyncadd [#allocation3], 192  ;;  %s275_s9 = smov [#allocation2]  }
   0x3   :  { %s14_s10 = sshll.u32 %s275_s9, 4  ;;  %s15_s10 = int_to_ptr.vmem [resolvable:$true] %s14_s10 }
   0x4   :  { %s239_s11 = scalar_lea.vmem %s15_s10, 64  ;;  %s243_s12 = scalar_lea.vmem %s15_s10, 256 }
   0x5   :  { %p240_p0 = scmp.ne.s32.totalorder %s15_s10, %s239_s11  ;;  %p244_p1 = scmp.lt.s32.totalorder %s15_s10, %s15_s10 }
   0x6   :  { %p245_p2 = scmp.lt.s32.totalorder %s243_s12, %s239_s11 }
   0x8   :  { %p246_p3 = por %p245_p2, %p244_p1 }
   0xa   :  { %p247_p4 = pnand %p246_p3, %p240_p0 }
   0xc   :  { %250 = shalt.err (!%p247_p4)
}
   0xd   :  { %s276_s13 = smov 64   ;;  %s277_s14 = smov 4  }
   0xe   :  { %20 = dma.hbm_to_vmem [thread:$0]  %s304_s0, 64, %s15_s10, [#allocation3], %s276_s13, %s276_s13, %s277_s14  }
   0xf   :  { %25 = vsyncadd [#allocation5], 192  ;;  %s278_s17 = smov [#allocation4]  }
  0x10   :  { %s26_s18 = sshll.u32 %s278_s17, 4  ;;  %s27_s18 = int_to_ptr.vmem [resolvable:$true] %s26_s18 }
  0x11   :  { %s259_s19 = scalar_lea.vmem %s27_s18, 64  ;;  %s263_s20 = scalar_lea.vmem %s27_s18, 256 }
  0x12   :  { %p260_p5 = scmp.ne.s32.totalorder %s27_s18, %s259_s19  ;;  %p264_p6 = scmp.lt.s32.totalorder %s27_s18, %s27_s18 }
  0x13   :  { %p265_p7 = scmp.lt.s32.totalorder %s263_s20, %s259_s19 }
  0x15   :  { %p266_p8 = por %p265_p7, %p264_p6 }
  0x17   :  { %p267_p9 = pnand %p266_p8, %p260_p5 }
  0x19   :  { %270 = shalt.err (!%p267_p9)
}
  0x1a   :  { %32 = dma.hbm_to_vmem [thread:$0]  %s305_s1, 64, %s27_s18, [#allocation5], %s276_s13, %s276_s13, %s277_s14  }
  0x1b   :  { %271 = dma.done.wait [#allocation3], 256  }
  0x1c   :  { %272 = vsyncadd [#allocation3], 4294967040 }
  0x1d   :  { %273 = dma.done.wait [#allocation5], 256  }
  0x1e   :  { %274 = vsyncadd [#allocation5], 4294967040  ;;  %v68_v0 = vlaneseq  ;;  %v279_v1 = vmov 1983009808   ;;  %v39_v5 = vld [vmem:[#allocation2] sm:$0xf] }
  0x1f   :  { %v66_v2 = vunpack.c.l.s4 %v279_v1  ;;  %v40_v6 = vld [vmem:[#allocation2 + $0x4] sm:$0xf]  ;;  %v41_v7 = vld [vmem:[#allocation2 + $0x8] sm:$0xf]  ;;  %v42_v8 = vld [vmem:[#allocation2 + $0xc] sm:$0xf]  ;;  %v93_v10 = vmul.f32 %v39_v5, %v39_v5 }
  0x20   :  { %v69_v4 = vshrl.u32 %v68_v0, 7  ;;  %v94_v11 = vmul.f32 %v40_v6, %v40_v6  ;;  %v95_v12 = vmul.f32 %v41_v7, %v41_v7  ;;  %v43_v13 = vld [vmem:[#allocation4] sm:$0xf]  ;;  %v44_v14 = vld [vmem:[#allocation4 + $0x4] sm:$0xf]  ;;  %v96_v15 = vmul.f32 %v42_v8, %v42_v8 }
  0x21   :  { %v67_v3 = vunpack.c.0.s8 %v66_v2  ;;  %v45_v16 = vld [vmem:[#allocation4 + $0x8] sm:$0xf]  ;;  %v46_v17 = vld [vmem:[#allocation4 + $0xc] sm:$0xf]  ;;  %v131_v18 = vmul.f32 %v43_v13, %v43_v13  ;;  %v132_v19 = vmul.f32 %v44_v14, %v44_v14  ;;  %v47_v20 = vsub.f32 %v39_v5, %v43_v13 }
  0x22   :  { %v101_v21 = vcombine.low %v93_v10, %v94_v11  ;;  %v133_v22 = vmul.f32 %v45_v16, %v45_v16  ;;  %v134_v23 = vmul.f32 %v46_v17, %v46_v17  ;;  %v48_v24 = vsub.f32 %v40_v6, %v44_v14 }
  0x23   :  { %v70_v9 = vsub.s32 %v67_v3, %v69_v4  ;;  %v102_v25 = vcombine.low %v95_v12, %v96_v15  ;;  %v139_v26 = vcombine.low %v131_v18, %v132_v19  ;;  %v49_v27 = vsub.f32 %v41_v7, %v45_v16 }
  0x24   :  { %v50_v28 = vsub.f32 %v42_v8, %v46_v17  ;;  %v140_v30 = vcombine.low %v133_v22, %v134_v23  ;;  %v51_v31 = vadd.f32 1e-06, %v47_v20  ;;  %v52_v32 = vadd.f32 1e-06, %v48_v24 }
  0x25   :  { %v109_v29 = vrot.slane %v101_v21, %v70_v9  ;;  %v116_v33 = vrot.slane %v102_v25, %v70_v9  ;;  %v147_v34 = vrot.slane %v139_v26, %v70_v9  ;;  %v53_v35 = vadd.f32 1e-06, %v49_v27 }
  0x26   :  { %v54_v36 = vadd.f32 1e-06, %v50_v28  ;;  %v154_v37 = vrot.slane %v140_v30, %v70_v9  ;;  %v55_v38 = vmul.f32 %v51_v31, %v51_v31  ;;  %v56_v39 = vmul.f32 %v52_v32, %v52_v32 }
  0x27   :  { %v117_v40 = vcombine.low %v109_v29, %v116_v33  ;;  %v118_v41 = vcombine.high %v109_v29, %v116_v33  ;;  %v57_v42 = vmul.f32 %v53_v35, %v53_v35  ;;  %vm173_vm6 = vcmask 7168  }
  0x28   :  { %v58_v43 = vmul.f32 %v54_v36, %v54_v36  ;;  %v155_v44 = vcombine.low %v147_v34, %v154_v37  ;;  %v156_v45 = vcombine.high %v147_v34, %v154_v37  ;;  %v63_v46 = vcombine.low %v55_v38, %v56_v39 }
  0x29   :  { %v121_v47 = vadd.f32 %v118_v41, %v117_v40 }
  0x2a   :  { %v64_v48 = vcombine.low %v57_v42, %v58_v43  ;;  %v71_v49 = vrot.slane %v63_v46, %v70_v9  ;;  %v159_v50 = vadd.f32 %v156_v45, %v155_v44 }
  0x2b   :  { %122 = vadd.xlane.f32.xlu0 %v121_v47 }
  0x2c   :  { %v78_v51 = vrot.slane %v64_v48, %v70_v9 }
  0x2e   :  { %v79_v52 = vcombine.low %v71_v49, %v78_v51  ;;  %v80_v53 = vcombine.high %v71_v49, %v78_v51 }
  0x2f   :  { %160 = vadd.xlane.f32.xlu0 %v159_v50 }
  0x30   :  { %v83_v54 = vadd.f32 %v80_v53, %v79_v52 }
  0x32   :  { %84 = vadd.xlane.f32.xlu1 %v83_v54 }
  0xb4   :  { %v123_v55 = vpop.xlane.xlu0 %122 }
  0xb5   :  { %223 = vrsqrt.f32 %v123_v55  ;;  %vm126_vm0 = vcmp.eq.f32.partialorder %v123_v55, inf  ;;  %v129_v63 = vand.u32 2147483648, %v123_v55  ;;  %vm128_vm2 = vcmp.eq.f32.partialorder %v123_v55, 0.0 }
  0xb8   :  { %v161_v56 = vpop.xlane.xlu0 %160 }
  0xb9   :  { %225 = vrsqrt.f32 %v161_v56  ;;  %vm164_vm1 = vcmp.eq.f32.partialorder %v161_v56, inf  ;;  %v167_v0 = vand.u32 2147483648, %v161_v56  ;;  %vm166_vm3 = vcmp.eq.f32.partialorder %v161_v56, 0.0 }
  0xbb   :  { %v85_v58 = vpop.xlane.xlu1 %84 }
  0xbc   :  { %227 = vrsqrt.f32 %v85_v58  ;;  %vm88_vm4 = vcmp.eq.f32.partialorder %v85_v58, inf  ;;  %v91_v8 = vand.u32 2147483648, %v85_v58  ;;  %vm90_vm5 = vcmp.eq.f32.partialorder %v85_v58, 0.0 }
  0xc2   :  { %v224_v57 = vpop.eup %223 }
  0xc3   :  { %v125_v59 = vmul.f32 %v224_v57, %v123_v55 }
  0xc5   :  { %v127_v61 = vsel %vm126_vm0, %v123_v55, %v125_v59 }
  0xc6   :  { %v226_v60 = vpop.eup %225  ;;  %v130_v2 = vsel %vm128_vm2, %v129_v63, %v127_v61 }
  0xc7   :  { %v163_v62 = vmul.f32 %v226_v60, %v161_v56 }
  0xc9   :  { %v165_v1 = vsel %vm164_vm1, %v161_v56, %v163_v62  ;;  %v228_v6 = vpop.eup %227 }
  0xca   :  { %v168_v3 = vsel %vm166_vm3, %v167_v0, %v165_v1  ;;  %v87_v7 = vmul.f32 %v228_v6, %v85_v58 }
  0xcb   :  { %v169_v4 = vadd.f32 %v168_v3, %v130_v2 }
  0xcc   :  { %v89_v9 = vsel %vm88_vm4, %v85_v58, %v87_v7 }
  0xcd   :  { %v170_v5 = vadd.f32 1e-15, %v169_v4  ;;  %v92_v11 = vsel %vm90_vm5, %v91_v8, %v89_v9 }
  0xcf   :  { %229 = vrcp.f32 %v170_v5 }
  0xdc   :  { %v230_v10 = vpop.eup %229 }
  0xdd   :  { %v172_v12 = vmul.f32 %v230_v10, %v92_v11 }
  0xdf   :  { %174 = vst.msk [vmem:[#allocation6] sm:$0xff] %vm173_vm6, %v172_v12 }
  0xe6   :  { %v193_v13 = vld [vmem:[#allocation6] sm:$0x3] }
  0xe7   :  { %194 = vst [vmem:[%s306_s2] sm:$0x3] %v193_v13 }
  0xe8   :  { %212 = vsyncpa [#allocation3], 1 }
  0xe9   :  { %213 = vsyncpa [#allocation5], 1 }

</bundles_post_ra>
